<compile_context>
chip_gen: v6e
topology: v6e:2x2x1
jax: 0.10.0
libtpu: 0.0.40
codegen_flags: <defaults>
</compile_context>

<pallas_src>
import functools

import jax
import jax.numpy as jnp
from jax import lax
from jax.experimental import pallas as pl
from jax.experimental.pallas import tpu as pltpu


def _round_up(x, m):
    return (x + m - 1) // m * m


def _default_tanh_dtype():
    """bf16 tanh on chips with bf16 EUP/VPU (v6e / v7x); f32 elsewhere (v5e & older)."""
    try:
        kind = jax.devices()[0].device_kind.lower()
    except Exception:
        return jnp.float32
    if "v6" in kind or "v7" in kind:
        return jnp.bfloat16
    return jnp.float32


def _weighted_pool(p, xf, use_mxu):
    """p: (TS, 1) f32 weights, xf: (TS, H) f32  ->  (1, H) weighted sum."""
    if use_mxu:
        # (1,TS) x (TS,H) contraction on the MXU (worth it once TS >= ~128).
        return lax.dot_general(p, xf, (((0,), (0,)), ((), ())),
                               preferred_element_type=jnp.float32)
    # Small TS: broadcast-multiply + sublane reduce (VPU/XLU); avoids MXU push/pop
    # latency for a sliver-sized matmul (preferred on v5e).
    return jnp.sum(xf * p, axis=0, keepdims=True)


def _atten_single_tile_kernel(S, Sp, H, tanh_dtype, use_mxu,
                              x_ref,     # (Sp, H)  gathered <mask> rows (input dtype)
                              w_ref,     # (1, H)   f32 attention vector
                              fcw_ref,   # (H, Cp)  f32 fc weight (transposed, lane-padded)
                              fcb_ref,   # (1, Cp)  f32 fc bias (lane-padded)
                              o_ref):    # (1, Cp)  f32 logits (lane-padded)
    """Default path: whole activation resident in VMEM -> plain softmax, one step."""
    x = x_ref[...]                                              # (Sp, H)
    xf = x.astype(jnp.float32)
    M = jnp.tanh(x.astype(tanh_dtype)).astype(jnp.float32)      # EUP; bf16 on v6e/v7x
    scores = jnp.sum(M * w_ref[...], axis=-1, keepdims=True)    # (Sp, 1)
    if Sp > S:                                                   # mask zero-padded rows
        row = lax.broadcasted_iota(jnp.int32, (Sp, 1), 0)
        scores = jnp.where(row < S, scores, -jnp.inf)
    m = jnp.max(scores, axis=0, keepdims=True)                   # (1, 1)
    p = jnp.exp(scores - m)                                      # padded rows -> 0
    alpha = p / jnp.sum(p, axis=0, keepdims=True)                # exact divide (runs once)
    pooled = jnp.maximum(_weighted_pool(alpha, xf, use_mxu), 0.0)   # relu, (1, H)
    logits = jnp.dot(pooled, fcw_ref[...],
                     preferred_element_type=jnp.float32) + fcb_ref[...]
    o_ref[...] = logits.astype(o_ref.dtype)                      # lane-dense store


def _atten_tiled_kernel(S, TS, H, tanh_dtype, use_mxu,
                        x_ref, w_ref, fcw_ref, fcb_ref, o_ref,
                        m_sc, l_sc, acc_sc):
    """Fallback for very large S*H: online softmax over a grid of (TS, H) tiles."""
    t = pl.program_id(0)
    nt = pl.num_programs(0)

    @pl.when(t == 0)
    def _():
        m_sc[...] = jnp.full((1, 1), -jnp.inf, jnp.float32)
        l_sc[...] = jnp.zeros((1, 1), jnp.float32)
        acc_sc[...] = jnp.zeros((1, H), jnp.float32)

    x = x_ref[...]                                               # (TS, H)
    xf = x.astype(jnp.float32)
    M = jnp.tanh(x.astype(tanh_dtype)).astype(jnp.float32)
    scores = jnp.sum(M * w_ref[...], axis=-1, keepdims=True)     # (TS, 1)
    row = t * TS + lax.broadcasted_iota(jnp.int32, (TS, 1), 0)
    scores = jnp.where(row < S, scores, -jnp.inf)

    m_prev = m_sc[...]
    m_new = jnp.maximum(m_prev, jnp.max(scores, axis=0, keepdims=True))
    corr = jnp.exp(m_prev - m_new)
    p = jnp.exp(scores - m_new)
    l_sc[...] = corr * l_sc[...] + jnp.sum(p, axis=0, keepdims=True)
    acc_sc[...] = corr * acc_sc[...] + _weighted_pool(p, xf, use_mxu)
    m_sc[...] = m_new

    @pl.when(t == nt - 1)
    def _():
        pooled = jnp.maximum(acc_sc[...] / l_sc[...], 0.0)        # exact divide, relu
        logits = jnp.dot(pooled, fcw_ref[...],
                         preferred_element_type=jnp.float32) + fcb_ref[...]
        o_ref[...] = logits.astype(o_ref.dtype)


def atten_forward_fused(x_rows, w, fc_w_t, fc_b, *,
                        tanh_dtype=None, max_tile_rows=None):
    """extract_at_mask(...).unsqueeze(0) + Atten.forward as one pallas_call.

    x_rows: (S, H) hidden states already gathered at the <mask> rows.
    w: (H,); fc_w_t: (H, C); fc_b: (C,).  Returns (1, C) f32 logits.
    """
    S, H = x_rows.shape
    C = fc_b.shape[-1]
    Cp = _round_up(C, 128)                      # lane-dense output store
    itemsize = jnp.dtype(x_rows.dtype).itemsize
    sub = max(8, 32 // itemsize)                # sublane packing: 8 f32, 16 bf16, 32 i8/fp8

    if tanh_dtype is None:
        tanh_dtype = _default_tanh_dtype()

    # Tile selection: default to a SINGLE resident (Sp, H) tile (nt == 1) whenever it
    # fits a conservative VMEM budget (v7x-safe).  S is the PLM batch, so this holds
    # in practice; the tiled online-softmax path is only a fallback.
    fixed = 2 * H * Cp * 4 + 8 * (Cp + H + 2) * 4 + (1 << 20)
    budget = 24 << 20

    def fits(rows):
        return 2 * rows * H * itemsize + fixed <= budget

    Sp_full = _round_up(max(S, 1), sub)
    cap = Sp_full if max_tile_rows is None else _round_up(max_tile_rows, sub)
    if Sp_full <= cap and fits(Sp_full):
        TS, nt = Sp_full, 1
    else:
        TS = max(sub, (min(cap, Sp_full) // sub) * sub)
        while TS > sub and not fits(TS):
            TS -= sub
        nt = pl.cdiv(S, TS)
    Sp = nt * TS
    use_mxu = TS >= 128

    xp = jnp.pad(x_rows, ((0, Sp - S), (0, 0)))     # zero-pad; rows masked in-kernel
    w2 = w.reshape(1, H).astype(jnp.float32)
    fcw_p = jnp.pad(fc_w_t.astype(jnp.float32), ((0, 0), (0, Cp - C)))
    fcb_p = jnp.pad(fc_b.reshape(1, C).astype(jnp.float32), ((0, 0), (0, Cp - C)))

    vmem_bytes = (2 * TS * H * itemsize + 2 * H * Cp * 4
                  + 16 * (Cp + H) * 4 + (2 << 20))
    vmem_bytes = int(min(max(vmem_bytes, 4 << 20), 32 << 20))
    cparams = pltpu.CompilerParams(dimension_semantics=("arbitrary",),
                                   vmem_limit_bytes=vmem_bytes)

    if nt == 1:
        kernel = functools.partial(_atten_single_tile_kernel, S, TS, H,
                                   tanh_dtype, use_mxu)
        out = pl.pallas_call(
            kernel,
            out_shape=jax.ShapeDtypeStruct((1, Cp), jnp.float32),
            grid=(1,),
            in_specs=[
                pl.BlockSpec((TS, H), lambda i: (0, 0)),    # gathered rows
                pl.BlockSpec((1, H), lambda i: (0, 0)),     # w
                pl.BlockSpec((H, Cp), lambda i: (0, 0)),    # fc weight (padded)
                pl.BlockSpec((1, Cp), lambda i: (0, 0)),    # fc bias (padded)
            ],
            out_specs=pl.BlockSpec((1, Cp), lambda i: (0, 0)),
            compiler_params=cparams,
        )(xp, w2, fcw_p, fcb_p)
    else:
        kernel = functools.partial(_atten_tiled_kernel, S, TS, H,
                                   tanh_dtype, use_mxu)
        out = pl.pallas_call(
            kernel,
            out_shape=jax.ShapeDtypeStruct((1, Cp), jnp.float32),
            grid=(nt,),
            in_specs=[
                pl.BlockSpec((TS, H), lambda t: (t, 0)),
                pl.BlockSpec((1, H), lambda t: (0, 0)),
                pl.BlockSpec((H, Cp), lambda t: (0, 0)),
                pl.BlockSpec((1, Cp), lambda t: (0, 0)),
            ],
            out_specs=pl.BlockSpec((1, Cp), lambda t: (0, 0)),
            scratch_shapes=[
                pltpu.VMEM((1, 1), jnp.float32),    # running max
                pltpu.VMEM((1, 1), jnp.float32),    # running denom
                pltpu.VMEM((1, H), jnp.float32),    # running weighted sum
            ],
            compiler_params=cparams,
        )(xp, w2, fcw_p, fcb_p)
    return out[:, :C]


def code_prompt_attention_previous_forward(hidden_states, loss_ids, params, *,
                                           tanh_dtype=None, max_tile_rows=None):
    """Mirrors CodePromptAttentionPrevious.forward after the PLM call.

    hidden_states: last-layer hidden states (B, L, H); loss_ids: (B, L) mask indicator.
    """
    # TODO(synk): assumes exactly one <mask> (loss_ids == 1) per row (num_mask_token==1);
    # the general ragged multi-mask variant of extract_at_mask is not expressed here.
    B = hidden_states.shape[0]
    mask_idx = jnp.argmax(loss_ids, axis=1)
    # Tiny (B, H) gather done wrapper-side (XLA); the kernel then sees one dense block.
    x_rows = hidden_states[jnp.arange(B), mask_idx]
    return atten_forward_fused(x_rows, params["w"], params["fc_w_t"], params["fc_b"],
                               tanh_dtype=tanh_dtype, max_tile_rows=max_tile_rows)


if __name__ == "__main__":
    # Small, deterministic shapes. batch is NOT a multiple of 8 so the in-kernel
    # padding/masking path is exercised.
    batch = 20         # PLM batch -> the "sequence" dim of the attention head
    seq_len = 16       # PLM sequence length
    hidden = 256       # config.hidden_size
    num_classes = 4    # verbalizer.num_classes / config.num_labels

    key = jax.random.PRNGKey(0)
    k_h, k_w, k_fw, k_fb, k_idx = jax.random.split(key, 5)

    hidden_states = jax.random.normal(k_h, (batch, seq_len, hidden), jnp.float32)

    # Exactly one <mask> position per example.
    mask_pos = jax.random.randint(k_idx, (batch,), 0, seq_len)
    loss_ids = jnp.zeros((batch, seq_len), jnp.int32).at[
        jnp.arange(batch), mask_pos].set(1)

    params = {
        "w": 0.1 * jax.random.normal(k_w, (hidden,), jnp.float32),
        "fc_w_t": 0.1 * jax.random.normal(k_fw, (hidden, num_classes), jnp.float32),
        "fc_b": 0.1 * jax.random.normal(k_fb, (num_classes,), jnp.float32),
    }

    # Pure-JAX f32 reference of the same math.
    x_g = hidden_states[jnp.arange(batch), mask_pos]                # (B, H)
    M = jnp.tanh(x_g)
    alpha = jax.nn.softmax(M @ params["w"], axis=0)[:, None]        # softmax over seq dim
    pooled = jnp.maximum(jnp.sum(x_g * alpha, axis=0), 0.0)         # (H,)
    ref = (pooled @ params["fc_w_t"] + params["fc_b"])[None, :]     # (1, C)

    # 1) Default path: single resident tile, forced f32 tanh -> tight tolerance.
    logits = code_prompt_attention_previous_forward(
        hidden_states, loss_ids, params, tanh_dtype=jnp.float32)
    logits = jax.block_until_ready(logits)
    assert logits.shape == (1, num_classes), logits.shape
    assert jnp.allclose(logits, ref, atol=1e-4, rtol=1e-4), (logits, ref)

    # 2) Forced grid-tiled online-softmax fallback (batch not a multiple of the tile).
    logits_t = code_prompt_attention_previous_forward(
        hidden_states, loss_ids, params, tanh_dtype=jnp.float32, max_tile_rows=8)
    logits_t = jax.block_until_ready(logits_t)
    assert jnp.allclose(logits_t, ref, atol=1e-4, rtol=1e-4), (logits_t, ref)

    # 3) Hardware-default tanh dtype (bf16 on v6e/v7x, f32 on v5e) -> loose tolerance.
    logits_a = code_prompt_attention_previous_forward(hidden_states, loss_ids, params)
    logits_a = jax.block_until_ready(logits_a)
    assert jnp.allclose(logits_a, ref, atol=5e-2, rtol=5e-2), (logits_a, ref)

    print("KERNEL_OK")
</pallas_src>

<mosaic_0001>
module attributes {stable_mosaic.version = 11 : i64} {
  func.func @_atten_single_tile_kernel(%arg0: i32, %arg1: memref<24x256xf32, #tpu.memory_space<vmem>>, %arg2: memref<1x256xf32, #tpu.memory_space<vmem>>, %arg3: memref<256x128xf32, #tpu.memory_space<vmem>>, %arg4: memref<1x128xf32, #tpu.memory_space<vmem>>, %arg5: memref<1x128xf32, #tpu.memory_space<vmem>>) attributes {dimension_semantics = [#tpu.dimension_semantics<arbitrary>], iteration_bounds = array<i64: 1>, scalar_prefetch = 0 : i64, scratch_operands = 0 : i64, tpu.core_type = #tpu.core_type<tc>, window_params = [{pipeline_mode = #tpu.pipeline_mode<synchronous>, transform_indices = @transform_0, window_bounds = array<i64: 24, 256>}, {pipeline_mode = #tpu.pipeline_mode<synchronous>, transform_indices = @transform_1, window_bounds = array<i64: 1, 256>}, {pipeline_mode = #tpu.pipeline_mode<synchronous>, transform_indices = @transform_2, window_bounds = array<i64: 256, 128>}, {pipeline_mode = #tpu.pipeline_mode<synchronous>, transform_indices = @transform_3, window_bounds = array<i64: 1, 128>}, {pipeline_mode = #tpu.pipeline_mode<synchronous>, transform_indices = @transform_4, window_bounds = array<i64: 1, 128>}]} {
    %c0 = arith.constant 0 : index
    %c0_0 = arith.constant 0 : index
    %0 = vector.load %arg1[%c0, %c0_0] : memref<24x256xf32, #tpu.memory_space<vmem>>, vector<24x256xf32>
    %1 = math.tanh %0 : vector<24x256xf32>
    %c0_1 = arith.constant 0 : index
    %c0_2 = arith.constant 0 : index
    %2 = vector.load %arg2[%c0_1, %c0_2] : memref<1x256xf32, #tpu.memory_space<vmem>>, vector<1x256xf32>
    %3 = vector.broadcast %2 : vector<1x256xf32> to vector<24x256xf32>
    %4 = arith.mulf %1, %3 : vector<24x256xf32>
    %cst = arith.constant dense<0.000000e+00> : vector<24xf32>
    %5 = vector.multi_reduction <add>, %4, %cst [1] : vector<24x256xf32> to vector<24xf32>
    %6 = vector.shape_cast %5 : vector<24xf32> to vector<24x1xf32>
    %7 = tpu.iota {dimensions = array<i32: 0>} : vector<24x1xi32>
    %c20_i32 = arith.constant 20 : i32
    %8 = vector.broadcast %c20_i32 : i32 to vector<24x1xi32>
    %9 = arith.cmpi slt, %7, %8 : vector<24x1xi32>
    %cst_3 = arith.constant 0xFF800000 : f32
    %10 = vector.broadcast %cst_3 : f32 to vector<24x1xf32>
    %11 = arith.select %9, %6, %10 : vector<24x1xi1>, vector<24x1xf32>
    %cst_4 = arith.constant dense<0xFF800000> : vector<1xf32>
    %12 = vector.multi_reduction <maximumf>, %11, %cst_4 [0] : vector<24x1xf32> to vector<1xf32>
    %13 = vector.shape_cast %12 : vector<1xf32> to vector<1x1xf32>
    %14 = vector.broadcast %13 : vector<1x1xf32> to vector<24x1xf32>
    %15 = arith.subf %11, %14 : vector<24x1xf32>
    %16 = math.exp %15 : vector<24x1xf32>
    %cst_5 = arith.constant dense<0.000000e+00> : vector<1xf32>
    %17 = vector.multi_reduction <add>, %16, %cst_5 [0] : vector<24x1xf32> to vector<1xf32>
    %18 = vector.shape_cast %17 : vector<1xf32> to vector<1x1xf32>
    %19 = vector.broadcast %18 : vector<1x1xf32> to vector<24x1xf32>
    %20 = arith.divf %16, %19 : vector<24x1xf32>
    %21 = vector.broadcast %20 : vector<24x1xf32> to vector<24x256xf32>
    %22 = arith.mulf %0, %21 : vector<24x256xf32>
    %cst_6 = arith.constant dense<0.000000e+00> : vector<256xf32>
    %23 = vector.multi_reduction <add>, %22, %cst_6 [0] : vector<24x256xf32> to vector<256xf32>
    %24 = vector.shape_cast %23 : vector<256xf32> to vector<1x256xf32>
    %cst_7 = arith.constant 0.000000e+00 : f32
    %25 = vector.broadcast %cst_7 : f32 to vector<1x256xf32>
    %26 = arith.maximumf %24, %25 : vector<1x256xf32>
    %c0_8 = arith.constant 0 : index
    %c0_9 = arith.constant 0 : index
    %27 = vector.load %arg3[%c0_8, %c0_9] : memref<256x128xf32, #tpu.memory_space<vmem>>, vector<256x128xf32>
    %cst_10 = arith.constant dense<0.000000e+00> : vector<1x128xf32>
    %28 = tpu.matmul %26, %27, %cst_10 {dimension_numbers = #tpu.dot_dimension_numbers<[1], [0], [0], [1], [0, 0, 1, 1], [], []>} : vector<1x256xf32>, vector<256x128xf32>, vector<1x128xf32> -> vector<1x128xf32>
    %c0_11 = arith.constant 0 : index
    %c0_12 = arith.constant 0 : index
    %29 = vector.load %arg4[%c0_11, %c0_12] : memref<1x128xf32, #tpu.memory_space<vmem>>, vector<1x128xf32>
    %30 = arith.addf %28, %29 : vector<1x128xf32>
    %c0_13 = arith.constant 0 : index
    %c0_14 = arith.constant 0 : index
    %31 = vector.load %arg5[%c0_13, %c0_14] : memref<1x128xf32, #tpu.memory_space<vmem>>, vector<1x128xf32>
    tpu.vector_store %arg5[%c0_13, %c0_14], %30 {strides = array<i32>} : memref<1x128xf32, #tpu.memory_space<vmem>>, vector<1x128xf32>,
    return
  }
  func.func @transform_0(%arg0: i32) -> (i32, i32) {
    %c0_i32 = arith.constant 0 : i32
    %c0_i32_0 = arith.constant 0 : i32
    %c0_i32_1 = arith.constant 0 : i32
    return %c0_i32, %c0_i32_0 : i32, i32
  }
  func.func @transform_1(%arg0: i32) -> (i32, i32) {
    %c0_i32 = arith.constant 0 : i32
    %c0_i32_0 = arith.constant 0 : i32
    %c0_i32_1 = arith.constant 0 : i32
    return %c0_i32, %c0_i32_0 : i32, i32
  }
  func.func @transform_2(%arg0: i32) -> (i32, i32) {
    %c0_i32 = arith.constant 0 : i32
    %c0_i32_0 = arith.constant 0 : i32
    %c0_i32_1 = arith.constant 0 : i32
    return %c0_i32, %c0_i32_0 : i32, i32
  }
  func.func @transform_3(%arg0: i32) -> (i32, i32) {
    %c0_i32 = arith.constant 0 : i32
    %c0_i32_0 = arith.constant 0 : i32
    %c0_i32_1 = arith.constant 0 : i32
    return %c0_i32, %c0_i32_0 : i32, i32
  }
  func.func @transform_4(%arg0: i32) -> (i32, i32) {
    %c0_i32 = arith.constant 0 : i32
    %c0_i32_0 = arith.constant 0 : i32
    %c0_i32_1 = arith.constant 0 : i32
    return %c0_i32, %c0_i32_0 : i32, i32
  }
}

</mosaic_0001>

<bundles_post_ra>
// kernel: tpu_custom_call.1
= control target key start
LH: loop header
LB: loop body
LE: loop exit
PB: predicated region body
PF: predicated region fallthrough
CT: control target
= control target key end

     0   :  { %9 = vsyncpa [#allocation3], 0  ;;  %s505_s0 = inlined_call_operand.hbm [shape: f32[24,256], index: 0, kind: input, shape index: {}]   ;;  %s506_s1 = inlined_call_operand.hbm [shape: f32[1,256], index: 1, kind: input, shape index: {}]   ;;  %s507_s2 = inlined_call_operand.hbm [shape: f32[256,128], index: 2, kind: input, shape index: {}]   ;;  %s508_s3 = inlined_call_operand.vmem [shape: f32[1,128], index: 3, kind: input, shape index: {}]   ;;  %s509_s4 = inlined_call_operand.hbm [shape: f32[1,128], index: 4, kind: output, shape index: {}]  }
   0x1   :  { %10 = vsyncpa [#allocation6], 0 }
   0x2   :  { %11 = vsyncpa [#allocation4], 0  ;;  %s428_s15 = smov [#allocation5]   ;;  %s429_s17 = smov [#allocation2]  }
   0x3   :  { %s30_s16 = sshll.u32 %s428_s15, 4  ;;  %s17_s18 = sshll.u32 %s429_s17, 4  ;;  %s31_s16 = int_to_ptr.vmem [resolvable:$true] %s30_s16  ;;  %s18_s18 = int_to_ptr.vmem [resolvable:$true] %s17_s18 }
   0x4   :  { %s350_s19 = scalar_lea.vmem %s31_s16, 32  ;;  %p355_p1 = scmp.lt.s32.totalorder %s31_s16, %s31_s16 }
   0x5   :  { %p351_p0 = scmp.ne.s32.totalorder %s31_s16, %s350_s19  ;;  %p356_p2 = scmp.lt.s32.totalorder %s350_s19, %s350_s19 }
   0x7   :  { %p357_p3 = por %p356_p2, %p355_p1 }
   0x9   :  { %p358_p4 = pnand %p357_p3, %p351_p0 }
   0xb   :  { %361 = shalt.err (!%p358_p4)
}
   0xc   :  { %33 = dma.hbm_to_vmem [thread:$0]  %s506_s1, 32, %s31_s16, [#allocation6]  }
   0xd   :  { %s370_s22 = scalar_lea.vmem %s18_s18, 768  ;;  %p375_p6 = scmp.lt.s32.totalorder %s18_s18, %s18_s18 }
   0xe   :  { %p371_p5 = scmp.ne.s32.totalorder %s18_s18, %s370_s22  ;;  %p376_p7 = scmp.lt.s32.totalorder %s370_s22, %s370_s22 }
  0x10   :  { %p377_p8 = por %p376_p7, %p375_p6 }
  0x12   :  { %p378_p9 = pnand %p377_p8, %p371_p5 }
  0x14   :  { %381 = shalt.err (!%p378_p9)
}
  0x15   :  { %s430_s23 = smov 256   ;;  %s431_s24 = smov 16  }
  0x16   :  { %23 = dma.hbm_to_vmem [thread:$0]  %s505_s0, 768, %s18_s18, [#allocation3], %s430_s23, %s430_s23, %s431_s24  }
  0x17   :  { %s432_s27 = smov [#allocation7]  }
  0x18   :  { %s39_s28 = sshll.u32 %s432_s27, 4  ;;  %s40_s28 = int_to_ptr.vmem [resolvable:$true] %s39_s28 }
  0x19   :  { %s390_s29 = scalar_lea.vmem %s40_s28, 4096  ;;  %p395_p11 = scmp.lt.s32.totalorder %s40_s28, %s40_s28 }
  0x1a   :  { %p391_p10 = scmp.ne.s32.totalorder %s40_s28, %s390_s29  ;;  %p396_p12 = scmp.lt.s32.totalorder %s390_s29, %s390_s29 }
  0x1c   :  { %p397_p13 = por %p396_p12, %p395_p11 }
  0x1e   :  { %p398_p0 = pnand %p397_p13, %p391_p10 }
  0x20   :  { %401 = shalt.err (!%p398_p0)
}
  0x21   :  { %s433_s1 = smov 128   ;;  %s434_s30 = smov 8  }
  0x22   :  { %45 = dma.hbm_to_vmem [thread:$0]  %s507_s2, 4096, %s40_s28, [#allocation6], %s433_s1, %s433_s1, %s434_s30  }
  0x23   :  { %422 = dma.done.wait [#allocation3], 768  }
  0x24   :  { %423 = vsyncadd [#allocation3], 4294966528 }
  0x25   :  { %424 = dma.done.wait [#allocation6], 4128  }
  0x26   :  { %425 = vsyncadd [#allocation6], 4294963168  ;;  %v71_v0 = vlaneseq  ;;  %v470_v1 = vld [vmem:[#allocation2] sm:$0xff]  ;;  %v472_v2 = vld [vmem:[#allocation2 + $0x8] sm:$0xff]  ;;  %s435_s7 = smov [#allocation8]  }
  0x27   :  { %322 = vtanh.f32 %v470_v1  ;;  %v475_v3 = vld [vmem:[#allocation2 + $0x10] sm:$0xff]  ;;  %v477_v4 = vld [vmem:[#allocation2 + $0x18] sm:$0xff]  ;;  %v480_v5 = vld [vmem:[#allocation2 + $0x20] sm:$0xff]  ;;  %s269_s8 = sshll.u32 %s435_s7, 4  ;;  %s270_s8 = int_to_ptr.vmem [resolvable:$true] %s269_s8 }
  0x28   :  { %324 = vtanh.f32 %v472_v2  ;;  %v482_v6 = vshrl.u32 %v71_v0, 7  ;;  %v485_v7 = vld [vmem:[#allocation2 + $0x28] sm:$0xff]  ;;  %v69_v9 = vld [vmem:[#allocation5] sm:$0x3]  ;;  %v188_v32 = vld [vmem:[#allocation7 + $0xe8] sm:$0xff]  ;;  %s402_s9 = scalar_lea.vmem %s270_s8, 16  ;;  %p407_p2 = scmp.lt.s32.totalorder %s270_s8, %s270_s8 }
  0x29   :  { %326 = vtanh.f32 %v475_v3  ;;  %v190_v28 = vld [vmem:[#allocation7 + $0xf8] sm:$0xff]  ;;  %v189_v30 = vld [vmem:[#allocation7 + $0xf0] sm:$0xff]  ;;  %v172_v33 = vld [vmem:[#allocation7 + $0x68] sm:$0xff]  ;;  %p403_p1 = scmp.ne.s32.totalorder %s270_s8, %s402_s9  ;;  %s406_s10 = scalar_lea.vmem %s270_s8, 32 }
  0x2a   :  { %328 = vtanh.f32 %v477_v4  ;;  %v73_v8 = vsub.s32 0, %v482_v6  ;;  %v77_v10 = vsub.s32 1, %v482_v6  ;;  %v174_v29 = vld [vmem:[#allocation7 + $0x78] sm:$0xff]  ;;  %279 = vmatprep.subr.mxu0 %v190_v28  ;;  %v173_v31 = vld [vmem:[#allocation7 + $0x70] sm:$0xff]  ;;  %v187_v34 = vld [vmem:[#allocation7 + $0xe0] sm:$0xff]  ;;  %v99_v60 = vadd.s32 16, %v482_v6  ;;  %p408_p3 = scmp.lt.s32.totalorder %s406_s10, %s402_s9 }
  0x2b   :  { %330 = vtanh.f32 %v480_v5  ;;  %280 = vmatpush3.msra.mxu0 %v174_v29  ;;  %v171_v35 = vld [vmem:[#allocation7 + $0x60] sm:$0xff]  ;;  %v186_v36 = vld [vmem:[#allocation7 + $0xd8] sm:$0xff]  ;;  %v185_v38 = vld [vmem:[#allocation7 + $0xd0] sm:$0xff] }
  0x2c   :  { %332 = vtanh.f32 %v485_v7  ;;  %v74_v11 = vrot.slane %v69_v9, %v73_v8  ;;  %v78_v12 = vrot.slane %v69_v9, %v77_v10  ;;  %281 = vmatprep.subr.mxu0 %v189_v30  ;;  %v170_v37 = vld [vmem:[#allocation7 + $0x58] sm:$0xff]  ;;  %v169_v39 = vld [vmem:[#allocation7 + $0x50] sm:$0xff]  ;;  %v184_v40 = vld [vmem:[#allocation7 + $0xc8] sm:$0xff]  ;;  %vm102_vm0 = vcmp.lt.s32.totalorder %v99_v60, 20  ;;  %p409_p4 = por %p408_p3, %p407_p2 }
  0x2d   :  { %282 = vmatpush3.msra.mxu0 %v173_v31  ;;  %v168_v41 = vld [vmem:[#allocation7 + $0x48] sm:$0xff]  ;;  %v183_v42 = vld [vmem:[#allocation7 + $0xc0] sm:$0xff]  ;;  %v182_v44 = vld [vmem:[#allocation7 + $0xb8] sm:$0xff] }
  0x2e   :  { %283 = vmatprep.subr.mxu0 %v188_v32  ;;  %v167_v43 = vld [vmem:[#allocation7 + $0x40] sm:$0xff]  ;;  %v166_v45 = vld [vmem:[#allocation7 + $0x38] sm:$0xff]  ;;  %v181_v46 = vld [vmem:[#allocation7 + $0xb0] sm:$0xff]  ;;  %p410_p5 = pnand %p409_p4, %p403_p1 }
  0x2f   :  { %284 = vmatpush3.msra.mxu0 %v172_v33  ;;  %v165_v47 = vld [vmem:[#allocation7 + $0x30] sm:$0xff]  ;;  %v180_v48 = vld [vmem:[#allocation7 + $0xa8] sm:$0xff]  ;;  %v179_v50 = vld [vmem:[#allocation7 + $0xa0] sm:$0xff] }
  0x30   :  { %285 = vmatprep.subr.mxu0 %v187_v34  ;;  %v164_v49 = vld [vmem:[#allocation7 + $0x28] sm:$0xff]  ;;  %v163_v51 = vld [vmem:[#allocation7 + $0x20] sm:$0xff]  ;;  %v178_v52 = vld [vmem:[#allocation7 + $0x98] sm:$0xff] }
  0x31   :  { %286 = vmatpush3.msra.mxu0 %v171_v35  ;;  %v162_v53 = vld [vmem:[#allocation7 + $0x18] sm:$0xff]  ;;  %v177_v54 = vld [vmem:[#allocation7 + $0x90] sm:$0xff]  ;;  %v176_v56 = vld [vmem:[#allocation7 + $0x88] sm:$0xff] }
  0x32   :  { %287 = vmatprep.subr.mxu0 %v186_v36  ;;  %v161_v55 = vld [vmem:[#allocation7 + $0x10] sm:$0xff]  ;;  %v160_v57 = vld [vmem:[#allocation7 + $0x8] sm:$0xff]  ;;  %v175_v58 = vld [vmem:[#allocation7 + $0x80] sm:$0xff] }
  0x33   :  { %288 = vmatpush3.msra.mxu0 %v170_v37  ;;  %v159_v59 = vld [vmem:[#allocation7] sm:$0xff] }
  0x34   :  { %v323_v13 = vpop.eup %322  ;;  %289 = vmatprep.subr.mxu0 %v185_v38 }
  0x35   :  { %v325_v14 = vpop.eup %324  ;;  %v81_v15 = vmul.f32 %v323_v13, %v74_v11  ;;  %290 = vmatpush3.msra.mxu0 %v169_v39 }
  0x36   :  { %v327_v16 = vpop.eup %326  ;;  %v82_v17 = vmul.f32 %v325_v14, %v78_v12  ;;  %291 = vmatprep.subr.mxu0 %v184_v40 }
  0x37   :  { %v329_v18 = vpop.eup %328  ;;  %v83_v19 = vmul.f32 %v327_v16, %v74_v11  ;;  %292 = vmatpush3.msra.mxu0 %v168_v41 }
  0x38   :  { %v331_v20 = vpop.eup %330  ;;  %v87_v21 = vadd.f32 %v82_v17, %v81_v15  ;;  %v84_v22 = vmul.f32 %v329_v18, %v78_v12  ;;  %293 = vmatprep.subr.mxu0 %v183_v42 }
  0x39   :  { %v333_v23 = vpop.eup %332  ;;  %v85_v24 = vmul.f32 %v331_v20, %v74_v11  ;;  %294 = vmatpush3.msra.mxu0 %v167_v43 }
  0x3a   :  { %88 = vadd.xlane.f32.xlu0 %v87_v21  ;;  %v90_v25 = vadd.f32 %v84_v22, %v83_v19  ;;  %v86_v26 = vmul.f32 %v333_v23, %v78_v12  ;;  %295 = vmatprep.subr.mxu0 %v182_v44 }
  0x3b   :  { %296 = vmatpush3.msra.mxu0 %v166_v45 }
  0x3c   :  { %v93_v27 = vadd.f32 %v86_v26, %v85_v24  ;;  %297 = vmatprep.subr.mxu0 %v181_v46 }
  0x3d   :  { %298 = vmatpush3.msra.mxu0 %v165_v47 }
  0x3e   :  { %91 = vadd.xlane.f32.xlu0 %v90_v25  ;;  %94 = vadd.xlane.f32.xlu1 %v93_v27 }
  0x3f   :  { %299 = vmatprep.subr.mxu0 %v180_v48 }
  0x40   :  { %300 = vmatpush3.msra.mxu0 %v164_v49 }
  0x41   :  { %301 = vmatprep.subr.mxu0 %v179_v50 }
  0x42   :  { %302 = vmatpush3.msra.mxu0 %v163_v51 }
  0x43   :  { %303 = vmatprep.subr.mxu0 %v178_v52 }
  0x44   :  { %304 = vmatpush3.msra.mxu0 %v162_v53 }
  0x45   :  { %305 = vmatprep.subr.mxu0 %v177_v54 }
  0x46   :  { %306 = vmatpush3.msra.mxu0 %v161_v55  ;;  %v191_v55 = vld [vmem:[%s508_s3] sm:$0x1] }
  0x47   :  { %307 = vmatprep.subr.mxu0 %v176_v56 }
  0x48   :  { %308 = vmatpush3.msra.mxu0 %v160_v57 }
  0x49   :  { %309 = vmatprep.subr.mxu0 %v175_v58 }
  0x4a   :  { %310 = vmatpush3.msra.mxu0 %v159_v59 }
  0xc3   :  { %v89_v61 = vpop.xlane.xlu0 %88 }
  0xc7   :  { %v92_v62 = vpop.xlane.xlu0 %91  ;;  %v95_v63 = vpop.xlane.xlu1 %94 }
  0xc8   :  { %v106_v0 = vmax.f32 %v89_v61, %v92_v62  ;;  %v105_v8 = vsel %vm102_vm0, %v95_v63, -inf }
  0xca   :  { %v107_v9 = vmax.f32 %v106_v0, %v105_v8 }
  0xcc   :  { %v108_v10 = vrot.slane %v107_v9, 4 }
  0xce   :  { %v109_v11 = vmax.f32 %v107_v9, %v108_v10 }
  0xd0   :  { %v110_v12 = vrot.slane %v109_v11, 2 }
  0xd2   :  { %v111_v13 = vmax.f32 %v109_v11, %v110_v12 }
  0xd4   :  { %v112_v14 = vrot.slane %v111_v13, 1 }
  0xd6   :  { %v113_v15 = vmax.f32 %v111_v13, %v112_v14 }
  0xd8   :  { %v114_v16 = vsub.f32 %v89_v61, %v113_v15  ;;  %v115_v17 = vsub.f32 %v92_v62, %v113_v15  ;;  %v116_v18 = vsub.f32 %v105_v8, %v113_v15 }
  0xda   :  { %v117_v19 = vmul.f32 1.442695, %v114_v16  ;;  %v119_v20 = vmul.f32 1.442695, %v115_v17  ;;  %v121_v21 = vmul.f32 1.442695, %v116_v18 }
  0xdc   :  { %334 = vpow2.f32 %v117_v19 }
  0xdd   :  { %336 = vpow2.f32 %v119_v20 }
  0xde   :  { %338 = vpow2.f32 %v121_v21 }
  0xe9   :  { %v335_v6 = vpop.eup %334 }
  0xea   :  { %v337_v22 = vpop.eup %336 }
  0xeb   :  { %v123_v23 = vadd.f32 %v337_v22, %v335_v6  ;;  %v339_v24 = vpop.eup %338 }
  0xed   :  { %v124_v25 = vadd.f32 %v339_v24, %v123_v23 }
  0xef   :  { %v125_v26 = vrot.slane %v124_v25, 4 }
  0xf1   :  { %v126_v27 = vadd.f32 %v125_v26, %v124_v25 }
  0xf3   :  { %v127_v28 = vrot.slane %v126_v27, 2 }
  0xf5   :  { %v128_v29 = vadd.f32 %v127_v28, %v126_v27 }
  0xf7   :  { %v129_v30 = vrot.slane %v128_v29, 1 }
  0xf9   :  { %v130_v31 = vadd.f32 %v129_v30, %v128_v29 }
  0xfb   :  { %340 = vrcp.f32 %v130_v31 }
 0x108   :  { %v341_v32 = vpop.eup %340 }
 0x109   :  { %v132_v33 = vmul.f32 %v341_v32, %v335_v6  ;;  %v133_v34 = vmul.f32 %v341_v32, %v337_v22  ;;  %v134_v35 = vmul.f32 %v341_v32, %v339_v24 }
 0x10b   :  { %v136_v36 = vmul.f32 %v132_v33, %v472_v2  ;;  %v138_v37 = vmul.f32 %v133_v34, %v477_v4  ;;  %v135_v38 = vmul.f32 %v132_v33, %v470_v1  ;;  %v137_v39 = vmul.f32 %v133_v34, %v475_v3 }
 0x10c   :  { %v140_v40 = vmul.f32 %v134_v35, %v485_v7  ;;  %v139_v42 = vmul.f32 %v134_v35, %v480_v5 }
 0x10d   :  { %v149_v41 = vadd.f32 %v138_v37, %v136_v36  ;;  %v141_v43 = vadd.f32 %v137_v39, %v135_v38 }
 0x10f   :  { %v150_v44 = vadd.f32 %v149_v41, %v140_v40  ;;  %v142_v45 = vadd.f32 %v141_v43, %v139_v42 }
 0x111   :  { %v151_v46 = vrot.slane %v150_v44, 4  ;;  %v143_v47 = vrot.slane %v142_v45, 4 }
 0x113   :  { %v152_v48 = vadd.f32 %v151_v46, %v150_v44  ;;  %v144_v49 = vadd.f32 %v143_v47, %v142_v45 }
 0x115   :  { %v153_v50 = vrot.slane %v152_v48, 2  ;;  %v145_v2 = vrot.slane %v144_v49, 2 }
 0x117   :  { %v154_v51 = vadd.f32 %v153_v50, %v152_v48  ;;  %v146_v4 = vadd.f32 %v145_v2, %v144_v49 }
 0x119   :  { %v155_v52 = vrot.slane %v154_v51, 1  ;;  %v147_v1 = vrot.slane %v146_v4, 1 }
 0x11b   :  { %v156_v53 = vadd.f32 %v155_v52, %v154_v51  ;;  %v148_v3 = vadd.f32 %v147_v1, %v146_v4 }
 0x11d   :  { %v158_v54 = vmax.f32 %v156_v53, 0.0  ;;  %v157_v7 = vmax.f32 %v148_v3, 0.0 }
 0x11f   :  { %256 = vmatprep.mubr.f32.mxu0 %v158_v54 }
 0x120   :  { %257 = vmatmul.mubr.f32.vlgmr.msra.gmra.mxu0 %v157_v7 }
 0x1e0   :  { %v311_v5 = vpop.f32.mrf.mxu0 }
 0x1e2   :  { %v312_v56 = vpop.f32.mrf.mxu0 }
 0x1e3   :  { %v313_v57 = vadd.f32 %v312_v56, %v311_v5 }
 0x1e5   :  { %v259_v58 = vadd.f32 %v313_v57, %v191_v55 }
 0x1e7   :  { %262 = vst [vmem:[#allocation8] sm:$0x1] %v259_v58 }
 0x1e8   :  { %413 = shalt.err (!%p410_p5)
}
 0x1e9   :  { %272 = dma.vmem_to_hbm [thread:$0]  %s270_s8, 16, %s509_s4, [#allocation4]  }
 0x1ea   :  { %426 = dma.done.wait [#allocation4], 16  }
 0x1eb   :  { %427 = vsyncadd [#allocation4], 4294967280 }
 0x1ec   :  { %276 = vsyncpa [#allocation3], 1 }
 0x1ed   :  { %277 = vsyncpa [#allocation6], 1 }
 0x1ee   :  { %278 = vsyncpa [#allocation4], 1 }

</bundles_post_ra>
